<compile_context>
chip_gen: v7x
topology: tpu7x:2x2x1
jax: 0.10.0
libtpu: 0.0.40
codegen_flags: <defaults>
</compile_context>

<pallas_src>
import functools

import jax
import jax.numpy as jnp
from jax.experimental import pallas as pl
from jax.experimental.pallas import tpu as pltpu

_LANES = 128
_SUBLANE_MULTIPLE = 32          # covers uint8 (32), bf16 (16), f32 (8) tiling
_MIN_GRID_STEPS = 8             # keep both v7x cores + pipeline busy
_MIN_BLOCK_ROWS = 256           # don't shrink blocks below ~32K pixels
_RAGGED_LANE_TILE = 256 * _LANES  # lane tile for the rare HW % 128 != 0 path
_VMEM_LIMIT_BYTES = 32 * 1024 * 1024


def _max_rows_per_block() -> int:
    """Rows (of 128 px) per grid step; v7x's faster HBM wants bigger steps."""
    rows = 2048
    try:  # best-effort generation detection; safe fallback if query fails
        info = pltpu.get_tpu_info()
        if "7" in str(getattr(info, "chip_version", "")):
            rows = 4096
    except Exception:
        pass
    return rows


def _pick_block_rows(n_images: int, rows: int, rows_cap: int) -> int:
    """Pick the per-step row-block so grid has enough steps but big blocks."""
    if rows <= _MIN_BLOCK_ROWS:
        return rows                       # full extent: always a legal block
    # Enough tiles per image so n * tiles >= _MIN_GRID_STEPS.
    want_tiles = max(1, pl.cdiv(_MIN_GRID_STEPS, n_images))
    s = pl.cdiv(rows, want_tiles)
    s = max(_MIN_BLOCK_ROWS, min(s, rows_cap))
    # Round to the sublane-tile multiple (32 covers u8/bf16/f32).
    s = pl.cdiv(s, _SUBLANE_MULTIPLE) * _SUBLANE_MULTIPLE
    return min(s, rows)


def _bgr_to_yuv444_kernel(x_ref, o_ref, *, channel_reversal, integer_out):
    # Block is (1, 3, S, 128) on the aligned path or (1, 3, 1, T) on the
    # ragged path; either way each channel read below is a dense 2-D slab.
    if channel_reversal:
        i_b, i_g, i_r = 2, 1, 0           # input channel order is R, G, B
    else:
        i_b, i_g, i_r = 0, 1, 2           # input channel order is B, G, R

    b = x_ref[0, i_b].astype(jnp.float32)
    g = x_ref[0, i_g].astype(jnp.float32)
    r = x_ref[0, i_r].astype(jnp.float32)

    y = 0.299 * r + 0.587 * g + 0.114 * b
    u = -0.1687 * r - 0.3313 * g + 0.5 * b + 128.0
    v = 0.5 * r - 0.4187 * g - 0.0813 * b + 128.0

    if integer_out:
        # Quantized output: round-to-nearest and clamp to the image range.
        y = jnp.clip(jnp.floor(y + 0.5), 0.0, 255.0).astype(jnp.int32)
        u = jnp.clip(jnp.floor(u + 0.5), 0.0, 255.0).astype(jnp.int32)
        v = jnp.clip(jnp.floor(v + 0.5), 0.0, 255.0).astype(jnp.int32)

    o_ref[0, 0] = y.astype(o_ref.dtype)
    o_ref[0, 1] = u.astype(o_ref.dtype)
    o_ref[0, 2] = v.astype(o_ref.dtype)


def bgr_to_yuv444(x, channel_reversal: bool = False, out_dtype=None, *,
                  _block_rows=None):
    """x: [N, 3, H, W] array (uint8 / bf16 / f32) with values in 0..255.

    out_dtype=None keeps the module semantics: float input -> same float
    dtype out; integer input -> float32 out.  Passing an integer out_dtype
    (e.g. jnp.uint8) additionally rounds + clamps to [0, 255] in-kernel.
    """
    assert isinstance(channel_reversal, bool), "'channel_reversal' must be bool"
    assert x.ndim == 4 and x.shape[1] == 3, "expected NCHW input with C == 3"
    n, c, h, w = x.shape
    hw = h * w

    in_dtype = jnp.dtype(x.dtype)
    if out_dtype is None:
        out_dtype = jnp.float32 if jnp.issubdtype(in_dtype, jnp.integer) else in_dtype
    out_dtype = jnp.dtype(out_dtype)
    integer_out = jnp.issubdtype(out_dtype, jnp.integer)

    kernel = functools.partial(
        _bgr_to_yuv444_kernel,
        channel_reversal=channel_reversal,
        integer_out=integer_out,
    )

    if hw % _LANES == 0:
        # Common path: free reshape to a sublane/lane dense [N,3,rows,128] view.
        rows = hw // _LANES
        x4 = x.reshape(n, c, rows, _LANES)
        # Cap the row block so the double-buffered in+out footprint stays
        # comfortably inside the VMEM limit (covers all dtype combinations).
        bytes_per_row = 2 * c * _LANES * (in_dtype.itemsize + out_dtype.itemsize)
        vmem_rows = int(0.75 * _VMEM_LIMIT_BYTES) // bytes_per_row
        rows_cap = max(_SUBLANE_MULTIPLE, min(_max_rows_per_block(), vmem_rows))
        if _block_rows is not None:
            s = min(int(_block_rows), rows)
        else:
            s = _pick_block_rows(n, rows, rows_cap)
        grid = (n, pl.cdiv(rows, s))
        block = (1, c, s, _LANES)
        out_view_shape = (n, c, rows, _LANES)
        index_map = lambda bi, ti: (bi, 0, ti, 0)
    else:
        # Rare path: HW not a multiple of 128.  Grid over the unpadded pixel
        # axis ([N,3,1,HW] view) and let Pallas clip the ragged trailing block
        # (no jnp.pad / slice round-trips through HBM).
        x4 = x.reshape(n, c, 1, hw)
        t = hw if hw <= _RAGGED_LANE_TILE else _RAGGED_LANE_TILE
        grid = (n, pl.cdiv(hw, t))
        block = (1, c, 1, t)
        out_view_shape = (n, c, 1, hw)
        index_map = lambda bi, ti: (bi, 0, 0, ti)

    npix = n * hw
    cost = pl.CostEstimate(
        flops=17 * npix,
        transcendentals=0,
        bytes_accessed=c * npix * (in_dtype.itemsize + out_dtype.itemsize),
    )

    out = pl.pallas_call(
        kernel,
        out_shape=jax.ShapeDtypeStruct(out_view_shape, out_dtype),
        grid_spec=pltpu.PrefetchScalarGridSpec(
            num_scalar_prefetch=0,
            grid=grid,
            in_specs=[pl.BlockSpec(block, index_map)],
            out_specs=pl.BlockSpec(block, index_map),
        ),
        compiler_params=pltpu.CompilerParams(
            dimension_semantics=("parallel", "parallel"),
            vmem_limit_bytes=_VMEM_LIMIT_BYTES,
        ),
        cost_estimate=cost,
    )(x4)

    return out.reshape(n, c, h, w)


def _reference(x, channel_reversal=False):
    xf = x.astype(jnp.float32)
    if channel_reversal:
        xf = xf[:, ::-1, :, :]
    b, g, r = xf[:, 0], xf[:, 1], xf[:, 2]
    y = 0.299 * r + 0.587 * g + 0.114 * b
    u = -0.1687 * r - 0.3313 * g + 0.5 * b + 128.0
    v = 0.5 * r - 0.4187 * g - 0.0813 * b + 128.0
    return jnp.stack([y, u, v], axis=1)


if __name__ == "__main__":
    key = jax.random.PRNGKey(0)
    k1, k2, k3 = jax.random.split(key, 3)

    # 1) float32 NCHW input in 0..255 (the module's standard float path).
    x_f32 = jax.random.uniform(k1, (2, 3, 16, 16), dtype=jnp.float32,
                               minval=0.0, maxval=255.0)
    out_bgr = jax.block_until_ready(bgr_to_yuv444(x_f32, channel_reversal=False))
    out_rgb = jax.block_until_ready(bgr_to_yuv444(x_f32, channel_reversal=True))
    assert out_bgr.shape == x_f32.shape and out_bgr.dtype == x_f32.dtype
    assert jnp.max(jnp.abs(out_bgr - _reference(x_f32, False))) < 1e-3
    assert jnp.max(jnp.abs(out_rgb - _reference(x_f32, True))) < 1e-3

    # 2) native uint8 input (no caller-side f32 conversion in HBM): f32 output
    #    by default, and opt-in quantized uint8 output (round + clamp in-kernel).
    x_u8 = jax.random.randint(k2, (2, 3, 16, 16), 0, 256,
                              dtype=jnp.int32).astype(jnp.uint8)
    out_u8_f32 = jax.block_until_ready(bgr_to_yuv444(x_u8))
    assert out_u8_f32.dtype == jnp.float32
    assert jnp.max(jnp.abs(out_u8_f32 - _reference(x_u8, False))) < 1e-3

    out_u8_u8 = jax.block_until_ready(bgr_to_yuv444(x_u8, out_dtype=jnp.uint8))
    ref_u8 = jnp.clip(jnp.floor(_reference(x_u8, False) + 0.5), 0, 255)
    assert out_u8_u8.dtype == jnp.uint8
    assert jnp.max(jnp.abs(out_u8_u8.astype(jnp.int32) - ref_u8.astype(jnp.int32))) <= 1

    # 3) HW not a multiple of 128 -> in-kernel ragged handling (no jnp.pad).
    x_odd = jax.random.uniform(k3, (1, 3, 10, 10), dtype=jnp.float32,
                               minval=0.0, maxval=255.0)
    out_odd = jax.block_until_ready(bgr_to_yuv444(x_odd, channel_reversal=False))
    assert out_odd.shape == x_odd.shape
    assert jnp.max(jnp.abs(out_odd - _reference(x_odd))) < 1e-3

    # 4) ragged trailing row-block (rows % block_rows != 0), locked in by test.
    x_rag = jax.random.uniform(k1, (1, 3, 40, 32), dtype=jnp.float32,
                               minval=0.0, maxval=255.0)
    out_rag = jax.block_until_ready(bgr_to_yuv444(x_rag, _block_rows=8))
    assert jnp.max(jnp.abs(out_rag - _reference(x_rag))) < 1e-3

    # TODO(synk): the plugin's QTensor/quantized-dispatch bookkeeping is not
    # modeled; only the arithmetic forward (float + optional u8 quant) is.
    print("KERNEL_OK")
</pallas_src>

<mosaic_0001>
module attributes {stable_mosaic.version = 11 : i64} {
  func.func @_bgr_to_yuv444_kernel(%arg0: i32, %arg1: i32, %arg2: memref<1x3x2x128xf32, #tpu.memory_space<vmem>>, %arg3: memref<1x3x2x128xf32, #tpu.memory_space<vmem>>) attributes {dimension_semantics = [#tpu.dimension_semantics<parallel>, #tpu.dimension_semantics<parallel>], iteration_bounds = array<i64: 2, 1>, scalar_prefetch = 0 : i64, scratch_operands = 0 : i64, tpu.core_type = #tpu.core_type<tc>, window_params = [{transform_indices = @transform_0, window_bounds = array<i64: 1, 3, 2, 128>}, {transform_indices = @transform_1, window_bounds = array<i64: 1, 3, 2, 128>}]} {
    %c0 = arith.constant 0 : index
    %c0_0 = arith.constant 0 : index
    %c0_1 = arith.constant 0 : index
    %c0_2 = arith.constant 0 : index
    %0 = vector.load %arg2[%c0, %c0_0, %c0_1, %c0_2] : memref<1x3x2x128xf32, #tpu.memory_space<vmem>>, vector<1x1x2x128xf32>
    %1 = vector.shape_cast %0 : vector<1x1x2x128xf32> to vector<2x128xf32>
    %c0_3 = arith.constant 0 : index
    %c1 = arith.constant 1 : index
    %c0_4 = arith.constant 0 : index
    %c0_5 = arith.constant 0 : index
    %2 = vector.load %arg2[%c0_3, %c1, %c0_4, %c0_5] : memref<1x3x2x128xf32, #tpu.memory_space<vmem>>, vector<1x1x2x128xf32>
    %3 = vector.shape_cast %2 : vector<1x1x2x128xf32> to vector<2x128xf32>
    %c0_6 = arith.constant 0 : index
    %c2 = arith.constant 2 : index
    %c0_7 = arith.constant 0 : index
    %c0_8 = arith.constant 0 : index
    %4 = vector.load %arg2[%c0_6, %c2, %c0_7, %c0_8] : memref<1x3x2x128xf32, #tpu.memory_space<vmem>>, vector<1x1x2x128xf32>
    %5 = vector.shape_cast %4 : vector<1x1x2x128xf32> to vector<2x128xf32>
    %cst = arith.constant 2.990000e-01 : f32
    %6 = vector.broadcast %cst : f32 to vector<2x128xf32>
    %7 = arith.mulf %6, %5 : vector<2x128xf32>
    %cst_9 = arith.constant 5.870000e-01 : f32
    %8 = vector.broadcast %cst_9 : f32 to vector<2x128xf32>
    %9 = arith.mulf %8, %3 : vector<2x128xf32>
    %10 = arith.addf %7, %9 : vector<2x128xf32>
    %cst_10 = arith.constant 1.140000e-01 : f32
    %11 = vector.broadcast %cst_10 : f32 to vector<2x128xf32>
    %12 = arith.mulf %11, %1 : vector<2x128xf32>
    %13 = arith.addf %10, %12 : vector<2x128xf32>
    %cst_11 = arith.constant -1.687000e-01 : f32
    %14 = vector.broadcast %cst_11 : f32 to vector<2x128xf32>
    %15 = arith.mulf %14, %5 : vector<2x128xf32>
    %cst_12 = arith.constant 3.313000e-01 : f32
    %16 = vector.broadcast %cst_12 : f32 to vector<2x128xf32>
    %17 = arith.mulf %16, %3 : vector<2x128xf32>
    %18 = arith.subf %15, %17 : vector<2x128xf32>
    %cst_13 = arith.constant 5.000000e-01 : f32
    %19 = vector.broadcast %cst_13 : f32 to vector<2x128xf32>
    %20 = arith.mulf %19, %1 : vector<2x128xf32>
    %21 = arith.addf %18, %20 : vector<2x128xf32>
    %cst_14 = arith.constant 1.280000e+02 : f32
    %22 = vector.broadcast %cst_14 : f32 to vector<2x128xf32>
    %23 = arith.addf %21, %22 : vector<2x128xf32>
    %cst_15 = arith.constant 5.000000e-01 : f32
    %24 = vector.broadcast %cst_15 : f32 to vector<2x128xf32>
    %25 = arith.mulf %24, %5 : vector<2x128xf32>
    %cst_16 = arith.constant 4.187000e-01 : f32
    %26 = vector.broadcast %cst_16 : f32 to vector<2x128xf32>
    %27 = arith.mulf %26, %3 : vector<2x128xf32>
    %28 = arith.subf %25, %27 : vector<2x128xf32>
    %cst_17 = arith.constant 0.0812999978 : f32
    %29 = vector.broadcast %cst_17 : f32 to vector<2x128xf32>
    %30 = arith.mulf %29, %1 : vector<2x128xf32>
    %31 = arith.subf %28, %30 : vector<2x128xf32>
    %cst_18 = arith.constant 1.280000e+02 : f32
    %32 = vector.broadcast %cst_18 : f32 to vector<2x128xf32>
    %33 = arith.addf %31, %32 : vector<2x128xf32>
    %c0_19 = arith.constant 0 : index
    %c0_20 = arith.constant 0 : index
    %c0_21 = arith.constant 0 : index
    %c0_22 = arith.constant 0 : index
    %34 = vector.load %arg3[%c0_19, %c0_20, %c0_21, %c0_22] : memref<1x3x2x128xf32, #tpu.memory_space<vmem>>, vector<1x1x2x128xf32>
    %35 = vector.shape_cast %34 : vector<1x1x2x128xf32> to vector<2x128xf32>
    %36 = vector.shape_cast %13 : vector<2x128xf32> to vector<1x1x2x128xf32>
    tpu.vector_store %arg3[%c0_19, %c0_20, %c0_21, %c0_22], %36 {strides = array<i32>} : memref<1x3x2x128xf32, #tpu.memory_space<vmem>>, vector<1x1x2x128xf32>,
    %c0_23 = arith.constant 0 : index
    %c1_24 = arith.constant 1 : index
    %c0_25 = arith.constant 0 : index
    %c0_26 = arith.constant 0 : index
    %37 = vector.load %arg3[%c0_23, %c1_24, %c0_25, %c0_26] : memref<1x3x2x128xf32, #tpu.memory_space<vmem>>, vector<1x1x2x128xf32>
    %38 = vector.shape_cast %37 : vector<1x1x2x128xf32> to vector<2x128xf32>
    %39 = vector.shape_cast %23 : vector<2x128xf32> to vector<1x1x2x128xf32>
    tpu.vector_store %arg3[%c0_23, %c1_24, %c0_25, %c0_26], %39 {strides = array<i32>} : memref<1x3x2x128xf32, #tpu.memory_space<vmem>>, vector<1x1x2x128xf32>,
    %c0_27 = arith.constant 0 : index
    %c2_28 = arith.constant 2 : index
    %c0_29 = arith.constant 0 : index
    %c0_30 = arith.constant 0 : index
    %40 = vector.load %arg3[%c0_27, %c2_28, %c0_29, %c0_30] : memref<1x3x2x128xf32, #tpu.memory_space<vmem>>, vector<1x1x2x128xf32>
    %41 = vector.shape_cast %40 : vector<1x1x2x128xf32> to vector<2x128xf32>
    %42 = vector.shape_cast %33 : vector<2x128xf32> to vector<1x1x2x128xf32>
    tpu.vector_store %arg3[%c0_27, %c2_28, %c0_29, %c0_30], %42 {strides = array<i32>} : memref<1x3x2x128xf32, #tpu.memory_space<vmem>>, vector<1x1x2x128xf32>,
    return
  }
  func.func @transform_0(%arg0: i32, %arg1: i32) -> (i32, i32, i32, i32) {
    %c0_i32 = arith.constant 0 : i32
    %c0_i32_0 = arith.constant 0 : i32
    %c0_i32_1 = arith.constant 0 : i32
    return %arg0, %c0_i32, %arg1, %c0_i32_0 : i32, i32, i32, i32
  }
  func.func @transform_1(%arg0: i32, %arg1: i32) -> (i32, i32, i32, i32) {
    %c0_i32 = arith.constant 0 : i32
    %c0_i32_0 = arith.constant 0 : i32
    %c0_i32_1 = arith.constant 0 : i32
    return %arg0, %c0_i32, %arg1, %c0_i32_0 : i32, i32, i32, i32
  }
}

</mosaic_0001>

<bundles_post_ra>
// kernel: tpu_custom_call.1
= control target key start
LH: loop header
LB: loop body
LE: loop exit
PB: predicated region body
PF: predicated region fallthrough
CT: control target
= control target key end

     0   :  { %6 = vsyncpa [#allocation3], 0  ;;  %s667_s0 = inlined_call_operand.hbm [shape: f32[2,3,2,128], index: 0, kind: input, shape index: {}]   ;;  %s668_s1 = inlined_call_operand.hbm [shape: f32[2,3,2,128], index: 1, kind: output, shape index: {}]  }
   0x1   :  { %8 = vsyncpa [#allocation3 + $0x1], 0 }
   0x2   :  { %9 = vsyncpa [#allocation4], 0 }
   0x3   :  { %11 = vsyncpa [#allocation4 + $0x1], 0  ;;  %s492_s6 = smov 0   ;;  %s494_s7 = smov 0  }
   0x4   :  { %s496_s8 = smov 0   ;;  %s498_s9 = smov 0  }
   0x5   :  { %s500_s10 = smov 0   ;;  %s502_s11 = smov 0  }
   0x6 LB: > { %s279_s12 = sadd.s32 4294967295, %s474_s11   ;;  %s280_s13 = sadd.s32 4294967294, %s474_s11   ;;  %s474_s11 = sphi %s502_s11, %s17_s11   ;;  %s470_s10 = sphi %s500_s10, %s683_s10   ;;  %s466_s9 = sphi %s498_s9, %s682_s9   ;;  %s462_s8 = sphi %s496_s8, %s681_s8   ;;  %s458_s7 = sphi %s494_s7, %s680_s7   ;;  %s454_s6 = sphi %s492_s6, %s679_s6  }
   0x7   : > { %s29_s14 = sadd.s32 1, %s470_s10  ;;  %s38_s15 = sadd.s32 1, %s462_s8 }
   0x8   : > { %p31_p0 = scmp.ge.s32.totalorder %s29_s14, 2  ;;  %p45_p1 = scmp.ne.s32.totalorder %s462_s8, %s458_s7 }
   0x9   : > { %p46_p2 = scmp.eq.s32.totalorder %s474_s11, 0  ;;  %p51_p3 = scmp.ne.s32.totalorder %s458_s7, %s454_s6 }
   0xa   : > { %s685_s14 = smov (%p31_p0, %s29_s14), 0  ;;  %p52_p5 = scmp.eq.s32.totalorder %s279_s12, 0 }
   0xb   : > { %p533_p4 = por %p46_p2, %p45_p1  ;;  %s33_s17 = ssub.s32 %s470_s10, %s685_s14 }
   0xc   : > { %p77_p6 = scmp.eq.s32.totalorder %s279_s12, 1  ;;  %p36_p7 = scmp.eq.s32.totalorder %s33_s17, 0 }
   0xd   : > { %p539_p8 = por %p52_p5, %p51_p3  ;;  %p83_p10 = scmp.eq.s32.totalorder %s280_s13, 1 }
   0xe   : > { %p543_p9 = por %p77_p6, %p45_p1  ;;  %p308_p13 = scmp.lt.s32.totalorder %s474_s11, 2 }
   0xf   : > { %s548_s20 = scalar_select %p36_p7, %s462_s8, %s38_s15  }
  0x10   : > { %s672_s19 = scalar_select %p543_p9, 1, 0 }
  0x11   : > { %p550_p11 = por %p83_p10, %p51_p3  ;;  %s103_s22 = sand.u32 1, %s462_s8  }
  0x12   : > { %s292_s23 = smul.u32 6, %s103_s22  ;;  %p560_p0 = pnand %p308_p13, %p533_p4 }
  0x13   : > { %s673_s21 = scalar_select %p550_p11, 1, 0 }
  0x14   : > { %s293_s24 = smul.u32 96, %s470_s10  ;;  %s107_s29 = scalar_lea.vmem [#allocation2], %s292_s23 }
  0x15   : > { %s115_s30 = sshll.u32 %s107_s29, 4  ;;  %s572_s2 = scalar_lea.sflag [#allocation3], %s103_s22  ;;  %s569_s30 = int_to_ptr.vmem [resolvable:$true] %s115_s30 }
  0x16   : > { %s567_s28 = scalar_lea.hbm %s667_s0, %s293_s24  ;;  %p364_p3 = pneg %p560_p0 }
  0x17   : > { %s362_s3 = scalar_lea.hbm %s567_s28, 96  ;;  %s367_s12 = scalar_lea.hbm %s667_s0, 192 }
  0x18   : > { %p363_p2 = scmp.ne.s32.totalorder %s567_s28, %s362_s3  ;;  %p368_p6 = scmp.lt.u32.totalorder %s567_s28, %s667_s0 }
  0x19   : > { %p369_p7 = scmp.lt.u32.totalorder %s367_s12, %s362_s3  ;;  %p371_p13 = scmp.lt.u32.totalorder %s362_s3, %s567_s28 }
  0x1a   : > { %p365_p4 = pnand %p364_p3, %p363_p2 }
  0x1b   : > { %p370_p10 = por %p369_p7, %p368_p6 }
  0x1c   : > { %p366_p5 = pneg %p365_p4 }
  0x1d   : > { %p372_p12 = por %p371_p13, %p370_p10 }
  0x1f   : > { %p373_p1 = pnand %p372_p12, %p366_p5 }
  0x21   : > { %376 = shalt.err (!%p373_p1)
}
  0x22   : > { %s377_s16 = scalar_lea.vmem %s569_s30, 96  ;;  %s476_s17 = smov [#allocation2]  }
  0x23   : > { %p378_p2 = scmp.ne.s32.totalorder %s569_s30, %s377_s16  ;;  %s382_s22 = sshll.u32 %s476_s17, 4  ;;  %s383_s22 = int_to_ptr.vmem [resolvable:$false] %s382_s22 }
  0x24   : > { %s384_s23 = scalar_lea.vmem %s383_s22, 192  ;;  %p385_p9 = scmp.lt.s32.totalorder %s569_s30, %s383_s22 }
  0x25   : > { %p380_p4 = pnand %p378_p2, %p364_p3  ;;  %p386_p6 = scmp.lt.s32.totalorder %s384_s23, %s377_s16 }
  0x27   : > { %p381_p11 = pneg %p380_p4  ;;  %p387_p7 = por %p386_p6, %p385_p9 }
  0x29   : > { %p388_p10 = pnand %p387_p7, %p381_p11 }
  0x2b   : > { %391 = shalt.err (!%p388_p10)
}
  0x2c   : > { %s477_s24 = smov 32   ;;  %s478_s26 = smov 2  }
  0x2d   : > { %303 = dma.hbm_to_vmem [thread:$0]  (!%p560_p0), %s567_s28, 96, %s569_s30, %s572_s2, %s477_s24, %s477_s24, %s478_s26  }
  0x2e   : > { %p123_p12 = scmp.lt.s32.totalorder %s474_s11, 3  ;;  %p675_p1 = scmp.ge.s32.totalorder %s474_s11, 1 }
  0x30   : > { %p124_p3 = pnand %p675_p1, %p123_p12 }
  0x31   : > { %s604_s27 = sand.u32 (!%p124_p3), 1, %s458_s7  }
  0x32   : > { %127 = sbr.rel (%p124_p3) target bundleno = 88 (0x58), region = 24  ;;  %s130_s3 = scalar_lea.sflag (!%p124_p3), [#allocation3], %s604_s27 }
  0x33   : > { %s294_s29 = smul.u32 (!%p124_p3), 6, %s604_s27 }
  0x35   : > { %s133_s4 = scalar_lea.vmem (!%p124_p3), [#allocation2], %s294_s29 }
  0x39   : > { %445 = dma.done.wait (%p539_p8), %s130_s3, 96  }
  0x3a   : > { %447 = vsyncadd (%p539_p8), %s130_s3, 4294967200  ;;  %v152_v0 = vld [vmem:[%s133_s4] sm:$0x3]  ;;  %v285_v1 = vld [vmem:[%s133_s4 + $0x2] sm:$0x3]  ;;  %s151_s25 = scalar_lea.vmem [#allocation5], %s294_s29 }
  0x3b   : > { %v286_v2 = vld [vmem:[%s133_s4 + $0x4] sm:$0x3]  ;;  %v158_v4 = vmul.f32 0.587, %v285_v1  ;;  %v160_v5 = vmul.f32 0.114, %v152_v0 }
  0x3c   : > { %v157_v3 = vmul.f32 0.299, %v286_v2  ;;  %v162_v6 = vmul.f32 -0.1687, %v286_v2  ;;  %v163_v7 = vmul.f32 0.3313, %v285_v1 }
  0x3d   : > { %v165_v8 = vmul.f32 0.5, %v152_v0  ;;  %v168_v9 = vmul.f32 0.5, %v286_v2  ;;  %v169_v11 = vmul.f32 0.4187, %v285_v1  ;;  %v171_v12 = vmul.f32 0.0813, %v152_v0 }
  0x3e   : > { %v159_v10 = vadd.f32 %v158_v4, %v157_v3  ;;  %v164_v13 = vsub.f32 %v162_v6, %v163_v7  ;;  %s194_s18 = sshll.u32 %s151_s25, 4  ;;  %s295_s28 = smul.u32 96, %s466_s9  ;;  %s613_s18 = int_to_ptr.vmem [resolvable:$true] %s194_s18 }
  0x3f   : > { %v170_v15 = vsub.f32 %v168_v9, %v169_v11  ;;  %s180_s12 = scalar_lea.sflag [#allocation4], %s604_s27  ;;  %s392_s13 = scalar_lea.vmem %s613_s18, 96 }
  0x40   : > { %v161_v14 = vadd.f32 %v160_v5, %v159_v10  ;;  %v166_v16 = vadd.f32 %v165_v8, %v164_v13  ;;  %s618_s5 = scalar_lea.hbm %s668_s1, %s295_s28  ;;  %p393_p8 = scmp.ne.s32.totalorder %s613_s18, %s392_s13 }
  0x41   : > { %v172_v17 = vsub.f32 %v170_v15, %v171_v12  ;;  %p676_p9 = scmp.ne.s32.totalorder %s672_s19, 0  ;;  %s479_s9 = smov [#allocation5]  }
  0x42   : > { %174 = vst [vmem:[%s151_s25] sm:$0x3] %v161_v14  ;;  %v167_v18 = vadd.f32 128.0, %v166_v16  ;;  %s396_s15 = sshll.u32 %s479_s9, 4  ;;  %s397_s15 = int_to_ptr.vmem [resolvable:$false] %s396_s15 }
  0x43   : > { %v173_v19 = vadd.f32 128.0, %v172_v17  ;;  %p394_p11 = pnand %p393_p8, %p676_p9  ;;  %s398_s16 = scalar_lea.vmem %s397_s15, 192 }
  0x44   : > { %287 = vst [vmem:[%s151_s25 + $0x2] sm:$0x3] %v167_v18  ;;  %p399_p5 = scmp.lt.s32.totalorder %s613_s18, %s397_s15  ;;  %p400_p13 = scmp.lt.s32.totalorder %s398_s16, %s392_s13 }
  0x45   : > { %288 = vst [vmem:[%s151_s25 + $0x4] sm:$0x3] %v173_v19  ;;  %p395_p0 = pneg %p394_p11 }
  0x46   : > { %p401_p2 = por %p400_p13, %p399_p5 }
  0x48   : > { %p402_p4 = pnand %p401_p2, %p395_p0 }
  0x4a   : > { %405 = shalt.err (!%p402_p4)
}
  0x4b   : > { %s406_s17 = scalar_lea.hbm %s618_s5, 96  ;;  %s410_s24 = scalar_lea.hbm %s668_s1, 192 }
  0x4c   : > { %p407_p6 = scmp.ne.s32.totalorder %s618_s5, %s406_s17  ;;  %p411_p12 = scmp.lt.u32.totalorder %s618_s5, %s668_s1 }
  0x4d   : > { %p412_p1 = scmp.lt.u32.totalorder %s410_s24, %s406_s17  ;;  %p414_p8 = scmp.lt.u32.totalorder %s406_s17, %s618_s5 }
  0x4e   : > { %p408_p7 = pnand %p407_p6, %p676_p9 }
  0x4f   : > { %p413_p3 = por %p412_p1, %p411_p12 }
  0x50   : > { %p409_p10 = pneg %p408_p7 }
  0x51   : > { %p415_p11 = por %p414_p8, %p413_p3 }
  0x53   : > { %p416_p0 = pnand %p415_p11, %p409_p10 }
  0x55   : > { %419 = shalt.err (!%p416_p0)
}
  0x56   : > { %s480_s3 = smov 32   ;;  %s481_s4 = smov 2  }
  0x57   : > { %298 = dma.vmem_to_hbm [thread:$0]  (%p676_p9), %s613_s18, 96, %s618_s5, %s180_s12, %s480_s3, %s480_s3, %s481_s4  }
  0x58 PF: > { %s209_s25 = sand.u32 1, %s454_s6   ;;  %p677_p5 = scmp.ne.s32.totalorder %s673_s21, 0 }
  0x59   : > { %p678_p13 = scmp.ge.s32.totalorder %s474_s11, 2  ;;  %s210_s28 = scalar_lea.sflag [#allocation4], %s209_s25 }
  0x5b   : > { %p305_p2 = pnand %p678_p13, %p677_p5 }
  0x5d   : > { %449 = dma.done.wait (!%p305_p2), %s210_s28, 96  }
  0x5e   : > { %451 = vsyncadd (!%p305_p2), %s210_s28, 4294967200  ;;  %s17_s11 = sadd.s32 1, %s474_s11   ;;  %s679_s6 = smov %s458_s7 }
  0x5f   : > { %p14_p4 = scmp.ge.s32.totalorder %s17_s11, 4   ;;  %s680_s7 = smov %s462_s8 }
  0x60   : > { %s681_s8 = smov %s548_s20  ;;  %s682_s9 = smov %s470_s10 }
  0x61   : > { %s683_s10 = smov %s685_s14  ;;  %16 = sbr.rel (!%p14_p4) target bundleno = 6 (0x6), region = 73 }
  0x68   :  { %215 = vsyncpa [#allocation3], 1 }
  0x69   :  { %217 = vsyncpa [#allocation3 + $0x1], 1 }
  0x6a   :  { %218 = vsyncpa [#allocation4], 1 }
  0x6b   :  { %220 = vsyncpa [#allocation4 + $0x1], 1 }

</bundles_post_ra>
